<compile_context>
chip_gen: v6e
topology: v6e:2x2x1
jax: 0.10.0
libtpu: 0.0.40
codegen_flags: <defaults>
</compile_context>

<pallas_src>
import functools

import jax
import jax.numpy as jnp
from jax.experimental import pallas as pl
from jax.experimental.pallas import tpu as pltpu


def _round_up(v, m):
    return ((v + m - 1) // m) * m


def _cdiv(a, b):
    return (a + b - 1) // b


def _vmem_capacity_bytes():
    """Physical VMEM per core; conservative v7x fallback if the query fails."""
    try:
        return int(pltpu.get_tpu_info().vmem_capacity_bytes)
    except Exception:
        return 64 * 1024 * 1024


def _block_spec(shape, index_map, single_buffer=False):
    """BlockSpec, optionally single-buffered (for grid-invariant operands)."""
    if single_buffer:
        try:
            return pl.BlockSpec(shape, index_map, pipeline_mode=pl.Buffered(1))
        except Exception:  # pipeline_mode unavailable -> default double buffer
            pass
    return pl.BlockSpec(shape, index_map)


# ---------------------------------------------------------------------------
# Kernel bodies
# ---------------------------------------------------------------------------

def _linear_kernel(x_ref, w_ref, b_ref, o_ref, *, compute_dtype):
    """o = x @ w + b, K un-tiled.  x is cast to compute_dtype in-kernel so the
    wrapper never re-writes the activation to HBM."""
    x = x_ref[...]
    if compute_dtype is not None:
        x = x.astype(compute_dtype)
    acc = jnp.dot(x, w_ref[...], preferred_element_type=jnp.float32)
    o_ref[...] = (acc + b_ref[...]).astype(o_ref.dtype)


def _linear_kernel_ktiled(x_ref, w_ref, b_ref, o_ref, acc_ref, *,
                          compute_dtype, k_total, tk):
    """K-tiled variant: f32 VMEM accumulator, init at k==0, bias+store at the
    last k step.  Out-of-range K entries of the partial last block are
    zero-masked on both operands (their content is unspecified)."""
    k = pl.program_id(2)

    @pl.when(k == 0)
    def _():
        acc_ref[...] = jnp.zeros_like(acc_ref)

    x = x_ref[...]
    w = w_ref[...]
    if compute_dtype is not None:
        x = x.astype(compute_dtype)
    if k_total % tk != 0:
        valid = k_total - k * tk          # K entries still in range this block
        col = jax.lax.broadcasted_iota(jnp.int32, x.shape, 1)
        row = jax.lax.broadcasted_iota(jnp.int32, w.shape, 0)
        x = jnp.where(col < valid, x, jnp.zeros_like(x))
        w = jnp.where(row < valid, w, jnp.zeros_like(w))

    acc_ref[...] += jnp.dot(x, w, preferred_element_type=jnp.float32)

    @pl.when(k == pl.num_programs(2) - 1)
    def _():
        o_ref[...] = (acc_ref[...] + b_ref[...]).astype(o_ref.dtype)


# ---------------------------------------------------------------------------
# Wrapper
# ---------------------------------------------------------------------------

def _linear_pallas(x2d, w, b, compute_dtype=None, single_buffer_invariants=True):
    """y = x2d @ w + b via a weight-stationary, row-tiled Pallas TPU kernel.

    x2d: (M, K)   w: (K, N) (= PyTorch weight.T)   b: (N,)
    """
    M, K = x2d.shape
    K2, N = w.shape
    assert K == K2
    out_dtype = x2d.dtype

    # Cast only W in the wrapper (small, one-time); x is cast inside the kernel.
    if compute_dtype is not None:
        w = w.astype(compute_dtype)
    b2d = jnp.asarray(b, jnp.float32).reshape(1, N)

    x_bytes = x2d.dtype.itemsize
    w_bytes = w.dtype.itemsize
    o_bytes = jnp.dtype(out_dtype).itemsize
    granule = 16 if compute_dtype == jnp.bfloat16 else 8

    # Generation-aware VMEM budget (v5e/v6e: 128 MiB physical, v7x: 64 MiB).
    vmem = _vmem_capacity_bytes()
    budget = int(vmem * 0.55)
    vmem_limit = int(vmem * 0.75)

    # --- N / K tiling: only when the resident weight slab would not fit -----
    wslab_budget = max(budget // 3, 1 << 20)
    if K * N * w_bytes <= wslab_budget or N <= 128:
        TN = N
    else:
        TN = max(128, min((wslab_budget // (K * w_bytes)) // 128 * 128,
                          (N // 128) * 128))
    ni = _cdiv(N, TN)

    if K * TN * w_bytes <= wslab_budget or K <= 128:
        TK = K
    else:
        TK = max(128, min((wslab_budget // (TN * w_bytes)) // 128 * 128,
                          (K // 128) * 128))
    nk = _cdiv(K, TK)

    w_invariant = (ni == 1 and nk == 1) and single_buffer_invariants
    b_invariant = (ni == 1 and nk == 1) and single_buffer_invariants

    # --- Row tile: grow to the largest multiple of `granule` that fits ------
    def footprint(tm):
        fb = 2 * tm * TK * x_bytes                         # double-buffered x
        fb += 2 * tm * TN * o_bytes                        # double-buffered out
        fb += (1 if w_invariant else 2) * TK * TN * w_bytes
        fb += (1 if b_invariant else 2) * TN * 4
        if nk > 1:
            fb += tm * TN * 4                              # f32 accumulator
        if compute_dtype is not None:
            fb += tm * TK * jnp.dtype(compute_dtype).itemsize  # in-kernel cast
        return fb

    TM = min(2048, _round_up(M, granule))
    while footprint(TM) > budget and TM > granule:
        TM = max(granule, (TM // 2) // granule * granule)

    # Megacore (v7x has 2 TensorCores): keep >= 4 row tiles when N is untiled.
    if ni == 1:
        TM = min(TM, max(granule, (M // 4) // granule * granule))
    mi = _cdiv(M, TM)

    cost = pl.CostEstimate(
        flops=2 * M * K * N,
        transcendentals=0,
        bytes_accessed=x_bytes * M * K + w_bytes * K * N + 4 * N
        + o_bytes * M * N,
    )

    if nk == 1:
        kernel = functools.partial(_linear_kernel, compute_dtype=compute_dtype)
        grid = (mi, ni)
        in_specs = [
            pl.BlockSpec((TM, K), lambda i, j: (i, 0)),          # x: row tiles
            _block_spec((K, TN), lambda i, j: (0, j),
                        single_buffer=w_invariant),              # W resident
            _block_spec((1, TN), lambda i, j: (0, j),
                        single_buffer=b_invariant),              # bias resident
        ]
        out_specs = pl.BlockSpec((TM, TN), lambda i, j: (i, j))
        scratch_shapes = ()
        dim_sem = ("parallel", "parallel")
    else:
        kernel = functools.partial(_linear_kernel_ktiled,
                                   compute_dtype=compute_dtype,
                                   k_total=K, tk=TK)
        grid = (mi, ni, nk)
        in_specs = [
            pl.BlockSpec((TM, TK), lambda i, j, k: (i, k)),
            pl.BlockSpec((TK, TN), lambda i, j, k: (k, j)),
            pl.BlockSpec((1, TN), lambda i, j, k: (0, j)),
        ]
        out_specs = pl.BlockSpec((TM, TN), lambda i, j, k: (i, j))
        scratch_shapes = [pltpu.VMEM((TM, TN), jnp.float32)]
        dim_sem = ("parallel", "parallel", "arbitrary")

    return pl.pallas_call(
        kernel,
        out_shape=jax.ShapeDtypeStruct((M, N), out_dtype),
        grid_spec=pltpu.PrefetchScalarGridSpec(
            num_scalar_prefetch=0,
            grid=grid,
            in_specs=in_specs,
            out_specs=out_specs,
            scratch_shapes=scratch_shapes,
        ),
        compiler_params=pltpu.CompilerParams(
            dimension_semantics=dim_sem,
            vmem_limit_bytes=vmem_limit,
        ),
        cost_estimate=cost,
    )(x2d, w, b2d)


# Below this many FLOPs a plain XLA dot beats the custom-call launch overhead.
_PALLAS_MIN_FLOPS = 1 << 24


def _linear(x2d, w, b, compute_dtype=None, force_pallas=False):
    M, K = x2d.shape
    N = w.shape[1]
    if not force_pallas and 2 * M * K * N < _PALLAS_MIN_FLOPS:
        xc = x2d if compute_dtype is None else x2d.astype(compute_dtype)
        wc = w if compute_dtype is None else w.astype(compute_dtype)
        y = jnp.dot(xc, wc, preferred_element_type=jnp.float32) + b
        return y.astype(x2d.dtype)
    try:
        return _linear_pallas(x2d, w, b, compute_dtype=compute_dtype,
                              single_buffer_invariants=True)
    except Exception:
        # Some lowerings may reject pl.Buffered(1) single-buffering; retry with
        # default double buffering (identical numerics).
        return _linear_pallas(x2d, w, b, compute_dtype=compute_dtype,
                              single_buffer_invariants=False)


def time_distributed_linear(x, w, b, batch_first=False,
                            compute_dtype=None, force_pallas=False):
    """JAX/Pallas equivalent of TimeDistributed(nn.Linear(K, N)).forward(x).

    w: (K, N) (= PyTorch weight.T), b: (N,).
    compute_dtype=jnp.bfloat16 is recommended for large-K layers on v5e/v6e
    (bf16-native MXU, f32 accumulation); default None keeps f32 throughout.
    """
    if x.ndim <= 2:
        return _linear(x, w, b, compute_dtype, force_pallas)

    K = x.shape[-1]
    x_reshape = x.reshape(-1, K)                      # x.contiguous().view(-1, F)
    y = _linear(x_reshape, w, b, compute_dtype, force_pallas)
    N = y.shape[-1]

    if batch_first:
        return y.reshape(x.shape[0], -1, N)           # y.view(x.size(0), -1, N)
    else:
        return y.reshape(-1, x.shape[1], N)           # y.view(-1, x.size(1), N)


if __name__ == "__main__":
    key = jax.random.PRNGKey(0)
    k_x, k_w, k_b, k_x2 = jax.random.split(key, 4)

    # batch_first=False layout: (time=8, batch=2, features=32)
    T, B, F_in, F_out = 8, 2, 32, 32
    x = jax.random.normal(k_x, (T, B, F_in), dtype=jnp.float32)

    # PyTorch Linear: y = x @ W.T + b
    W_t = jax.random.normal(k_w, (F_out, F_in), dtype=jnp.float32) * 0.1
    w = W_t.T                                              # (K, N)
    b = jax.random.normal(k_b, (F_out,), dtype=jnp.float32) * 0.1

    # 1) time-major (batch_first=False); force the Pallas path at demo size.
    y = jax.block_until_ready(
        time_distributed_linear(x, w, b, batch_first=False, force_pallas=True))
    assert y.shape == (T, B, F_out), y.shape
    y_ref = (x.reshape(-1, F_in) @ w + b).reshape(-1, B, F_out)
    assert jnp.allclose(y, y_ref, atol=1e-5, rtol=1e-5)

    # 2) batch_first=True layout.
    xb = jnp.transpose(x, (1, 0, 2))                       # (B, T, F_in)
    yb = jax.block_until_ready(
        time_distributed_linear(xb, w, b, batch_first=True, force_pallas=True))
    assert yb.shape == (B, T, F_out), yb.shape
    yb_ref = (xb.reshape(-1, F_in) @ w + b).reshape(B, -1, F_out)
    assert jnp.allclose(yb, yb_ref, atol=1e-5, rtol=1e-5)

    # 3) M not a multiple of the row tile -> exercises the partial last block.
    x_odd = jax.random.normal(k_x2, (5, 3, F_in), dtype=jnp.float32)
    y_odd = jax.block_until_ready(
        time_distributed_linear(x_odd, w, b, batch_first=False,
                                force_pallas=True))
    assert y_odd.shape == (5, 3, F_out), y_odd.shape
    y_odd_ref = (x_odd.reshape(-1, F_in) @ w + b).reshape(-1, 3, F_out)
    assert jnp.allclose(y_odd, y_odd_ref, atol=1e-5, rtol=1e-5)

    # 4) <=2-D early-return path (auto-dispatch: XLA dot at this tiny size).
    x2d = jax.random.normal(k_x, (B, F_in), dtype=jnp.float32)
    y2d = jax.block_until_ready(time_distributed_linear(x2d, w, b))
    assert y2d.shape == (B, F_out)
    assert jnp.allclose(y2d, x2d @ w + b, atol=1e-5, rtol=1e-5)

    # 5) bf16 compute path (W cast in wrapper, x cast in-kernel, f32 accum).
    y_bf = jax.block_until_ready(
        time_distributed_linear(x, w, b, batch_first=False,
                                compute_dtype=jnp.bfloat16, force_pallas=True))
    assert y_bf.shape == (T, B, F_out)
    assert jnp.allclose(y_bf, y_ref, atol=5e-2, rtol=5e-2)

    print("KERNEL_OK")
</pallas_src>

<mosaic_0001>
module attributes {stable_mosaic.version = 11 : i64} {
  func.func @_linear_kernel(%arg0: i32, %arg1: i32, %arg2: memref<8x32xf32, #tpu.memory_space<vmem>>, %arg3: memref<32x32xf32, #tpu.memory_space<vmem>>, %arg4: memref<1x32xf32, #tpu.memory_space<vmem>>, %arg5: memref<8x32xf32, #tpu.memory_space<vmem>>) attributes {dimension_semantics = [#tpu.dimension_semantics<parallel>, #tpu.dimension_semantics<parallel>], iteration_bounds = array<i64: 2, 1>, scalar_prefetch = 0 : i64, scratch_operands = 0 : i64, tpu.core_type = #tpu.core_type<tc>, window_params = [{transform_indices = @transform_0, window_bounds = array<i64: 8, 32>}, {pipeline_mode = #tpu.pipeline_mode<synchronous>, transform_indices = @transform_1, window_bounds = array<i64: 32, 32>}, {pipeline_mode = #tpu.pipeline_mode<synchronous>, transform_indices = @transform_2, window_bounds = array<i64: 1, 32>}, {transform_indices = @transform_3, window_bounds = array<i64: 8, 32>}]} {
    %c0 = arith.constant 0 : index
    %c0_0 = arith.constant 0 : index
    %0 = vector.load %arg2[%c0, %c0_0] : memref<8x32xf32, #tpu.memory_space<vmem>>, vector<8x32xf32>
    %c0_1 = arith.constant 0 : index
    %c0_2 = arith.constant 0 : index
    %1 = vector.load %arg3[%c0_1, %c0_2] : memref<32x32xf32, #tpu.memory_space<vmem>>, vector<32x32xf32>
    %cst = arith.constant dense<0.000000e+00> : vector<8x32xf32>
    %2 = tpu.matmul %0, %1, %cst {dimension_numbers = #tpu.dot_dimension_numbers<[1], [0], [0], [1], [0, 0, 1, 1], [], []>} : vector<8x32xf32>, vector<32x32xf32>, vector<8x32xf32> -> vector<8x32xf32>
    %c0_3 = arith.constant 0 : index
    %c0_4 = arith.constant 0 : index
    %3 = vector.load %arg4[%c0_3, %c0_4] : memref<1x32xf32, #tpu.memory_space<vmem>>, vector<1x32xf32>
    %4 = vector.broadcast %3 : vector<1x32xf32> to vector<8x32xf32>
    %5 = arith.addf %2, %4 : vector<8x32xf32>
    %c0_5 = arith.constant 0 : index
    %c0_6 = arith.constant 0 : index
    %6 = vector.load %arg5[%c0_5, %c0_6] : memref<8x32xf32, #tpu.memory_space<vmem>>, vector<8x32xf32>
    tpu.vector_store %arg5[%c0_5, %c0_6], %5 {strides = array<i32>} : memref<8x32xf32, #tpu.memory_space<vmem>>, vector<8x32xf32>,
    return
  }
  func.func @transform_0(%arg0: i32, %arg1: i32) -> (i32, i32) {
    %c0_i32 = arith.constant 0 : i32
    %c0_i32_0 = arith.constant 0 : i32
    return %arg0, %c0_i32 : i32, i32
  }
  func.func @transform_1(%arg0: i32, %arg1: i32) -> (i32, i32) {
    %c0_i32 = arith.constant 0 : i32
    %c0_i32_0 = arith.constant 0 : i32
    return %c0_i32, %arg1 : i32, i32
  }
  func.func @transform_2(%arg0: i32, %arg1: i32) -> (i32, i32) {
    %c0_i32 = arith.constant 0 : i32
    %c0_i32_0 = arith.constant 0 : i32
    return %c0_i32, %arg1 : i32, i32
  }
  func.func @transform_3(%arg0: i32, %arg1: i32) -> (i32, i32) {
    %c0_i32 = arith.constant 0 : i32
    return %arg0, %arg1 : i32, i32
  }
}

module attributes {stable_mosaic.version = 11 : i64} {
  func.func @_linear_kernel(%arg0: i32, %arg1: i32, %arg2: memref<8x32xf32, #tpu.memory_space<vmem>>, %arg3: memref<32x32xf32, #tpu.memory_space<vmem>>, %arg4: memref<1x32xf32, #tpu.memory_space<vmem>>, %arg5: memref<8x32xf32, #tpu.memory_space<vmem>>) attributes {dimension_semantics = [#tpu.dimension_semantics<parallel>, #tpu.dimension_semantics<parallel>], iteration_bounds = array<i64: 2, 1>, scalar_prefetch = 0 : i64, scratch_operands = 0 : i64, tpu.core_type = #tpu.core_type<tc>, window_params = [{transform_indices = @transform_0, window_bounds = array<i64: 8, 32>}, {transform_indices = @transform_1, window_bounds = array<i64: 32, 32>}, {transform_indices = @transform_2, window_bounds = array<i64: 1, 32>}, {transform_indices = @transform_3, window_bounds = array<i64: 8, 32>}]} {
    %c0 = arith.constant 0 : index
    %c0_0 = arith.constant 0 : index
    %0 = vector.load %arg2[%c0, %c0_0] : memref<8x32xf32, #tpu.memory_space<vmem>>, vector<8x32xf32>
    %c0_1 = arith.constant 0 : index
    %c0_2 = arith.constant 0 : index
    %1 = vector.load %arg3[%c0_1, %c0_2] : memref<32x32xf32, #tpu.memory_space<vmem>>, vector<32x32xf32>
    %cst = arith.constant dense<0.000000e+00> : vector<8x32xf32>
    %2 = tpu.matmul %0, %1, %cst {dimension_numbers = #tpu.dot_dimension_numbers<[1], [0], [0], [1], [0, 0, 1, 1], [], []>} : vector<8x32xf32>, vector<32x32xf32>, vector<8x32xf32> -> vector<8x32xf32>
    %c0_3 = arith.constant 0 : index
    %c0_4 = arith.constant 0 : index
    %3 = vector.load %arg4[%c0_3, %c0_4] : memref<1x32xf32, #tpu.memory_space<vmem>>, vector<1x32xf32>
    %4 = vector.broadcast %3 : vector<1x32xf32> to vector<8x32xf32>
    %5 = arith.addf %2, %4 : vector<8x32xf32>
    %c0_5 = arith.constant 0 : index
    %c0_6 = arith.constant 0 : index
    %6 = vector.load %arg5[%c0_5, %c0_6] : memref<8x32xf32, #tpu.memory_space<vmem>>, vector<8x32xf32>
    tpu.vector_store %arg5[%c0_5, %c0_6], %5 {strides = array<i32>} : memref<8x32xf32, #tpu.memory_space<vmem>>, vector<8x32xf32>,
    return
  }
  func.func @transform_0(%arg0: i32, %arg1: i32) -> (i32, i32) {
    %c0_i32 = arith.constant 0 : i32
    %c0_i32_0 = arith.constant 0 : i32
    return %arg0, %c0_i32 : i32, i32
  }
  func.func @transform_1(%arg0: i32, %arg1: i32) -> (i32, i32) {
    %c0_i32 = arith.constant 0 : i32
    %c0_i32_0 = arith.constant 0 : i32
    return %c0_i32, %arg1 : i32, i32
  }
  func.func @transform_2(%arg0: i32, %arg1: i32) -> (i32, i32) {
    %c0_i32 = arith.constant 0 : i32
    %c0_i32_0 = arith.constant 0 : i32
    return %c0_i32, %arg1 : i32, i32
  }
  func.func @transform_3(%arg0: i32, %arg1: i32) -> (i32, i32) {
    %c0_i32 = arith.constant 0 : i32
    return %arg0, %arg1 : i32, i32
  }
}

</mosaic_0001>

<bundles_post_ra>
// kernel: tpu_custom_call.1
= control target key start
LH: loop header
LB: loop body
LE: loop exit
PB: predicated region body
PF: predicated region fallthrough
CT: control target
= control target key end

     0   :  { %8 = vsyncpa [#allocation3], 0  ;;  %s895_s0 = inlined_call_operand.hbm [shape: f32[16,32], index: 0, kind: input, shape index: {}]   ;;  %s896_s1 = inlined_call_operand.hbm [shape: f32[32,32], index: 1, kind: input, shape index: {}]   ;;  %s897_s2 = inlined_call_operand.vmem [shape: f32[1,32], index: 2, kind: input, shape index: {}]   ;;  %s898_s3 = inlined_call_operand.hbm [shape: f32[16,32], index: 3, kind: output, shape index: {}]  }
   0x1   :  { %10 = vsyncpa [#allocation3 + $0x1], 0 }
   0x2   :  { %11 = vsyncpa [#allocation6], 0 }
   0x3   :  { %12 = vsyncpa [#allocation4], 0 }
   0x4   :  { %14 = vsyncpa [#allocation4 + $0x1], 0  ;;  %s719_s12 = smov 0   ;;  %s721_s13 = smov 0  }
   0x5   :  { %s723_s14 = smov 0   ;;  %s725_s15 = smov 0  }
   0x6   :  { %s727_s16 = smov 0   ;;  %s729_s17 = smov 0  }
   0x7 LB: > { %s441_s18 = sadd.s32 4294967295, %s690_s17   ;;  %s442_s19 = sadd.s32 4294967294, %s690_s17   ;;  %s690_s17 = sphi %s729_s17, %s20_s17   ;;  %s686_s16 = sphi %s727_s16, %s916_s16   ;;  %s682_s15 = sphi %s725_s15, %s915_s15   ;;  %s678_s14 = sphi %s723_s14, %s914_s14   ;;  %s674_s13 = sphi %s721_s13, %s913_s13   ;;  %s670_s12 = sphi %s719_s12, %s912_s12  }
   0x8   : > { %p52_p0 = scmp.ne.s32.totalorder %s674_s13, %s670_s12  ;;  %p753_p1 = scmp.eq.s32.totalorder %s441_s18, 0 }
   0x9   : > { %p757_p2 = scmp.eq.s32.totalorder %s441_s18, 1  ;;  %p136_p3 = scmp.eq.s32.totalorder %s442_s19, 1 }
   0xa   : > { %p763_p4 = por %p753_p1, %p52_p0  ;;  %p443_p5 = scmp.ge.s32.totalorder %s690_s17, 1 }
   0xb   : > { %p768_p6 = por %p136_p3, %p52_p0  ;;  %p143_p7 = scmp.lt.s32.totalorder %s690_s17, 3 }
   0xc   : > { %s902_s22 = scalar_select %p763_p4, 1, 0 }
   0xd   : > { %s903_s23 = scalar_select %p768_p6, 1, 0 }
   0xe   : > { %p773_p8 = pnand %p443_p5, %p143_p7  ;;  %s692_s25 = smov [#allocation5]  }
   0xf   : > { %s157_s26 = sshll.u32 %s692_s25, 4  ;;  %s32_s28 = sadd.s32 1, %s686_s16  ;;  %s158_s26 = int_to_ptr.vmem [resolvable:$true] %s157_s26 }
  0x10   : > { %p483_p9 = pneg %p773_p8  ;;  %s563_s29 = scalar_lea.vmem %s158_s26, 512 }
  0x11   : > { %p564_p13 = scmp.ne.s32.totalorder %s158_s26, %s563_s29  ;;  %p571_p5 = scmp.lt.s32.totalorder %s158_s26, %s158_s26 }
  0x12   : > { %p782_p11 = pnand %p483_p9, %p753_p1  ;;  %p572_p7 = scmp.lt.s32.totalorder %s563_s29, %s563_s29 }
  0x14   : > { %p554_p12 = pneg %p782_p11  ;;  %p573_p6 = por %p572_p7, %p571_p5 }
  0x16   : > { %p566_p0 = pnand %p564_p13, %p554_p12 }
  0x18   : > { %p567_p3 = pneg %p566_p0 }
  0x1a   : > { %p574_p4 = pnand %p573_p6, %p567_p3 }
  0x1c   : > { %577 = shalt.err (!%p574_p4)
}
  0x1d   : > { %s693_s30 = smov 128   ;;  %s694_s4 = smov 8  }
  0x1e   : > { %486 = dma.hbm_to_vmem [thread:$0]  (!%p782_p11), %s896_s1, 512, %s158_s26, [#allocation6], %s693_s30, %s693_s30, %s694_s4  }
  0x1f   : > { %p34_p6 = scmp.ge.s32.totalorder %s32_s28, 2  ;;  %s39_s7 = sadd.s32 1, %s678_s14 }
  0x20   : > { %p46_p4 = scmp.ne.s32.totalorder %s678_s14, %s674_s13  ;;  %p47_p9 = scmp.eq.s32.totalorder %s690_s17, 0 }
  0x21   : > { %s918_s28 = smov (%p34_p6, %s32_s28), 0  ;;  %p496_p0 = scmp.lt.s32.totalorder %s690_s17, 2 }
  0x22   : > { %p800_p12 = por %p47_p9, %p46_p4  ;;  %p806_p13 = por %p757_p2, %p46_p4 }
  0x23   : > { %s36_s10 = ssub.s32 %s686_s16, %s918_s28  ;;  %s177_s11 = sand.u32 1, %s678_s14  }
  0x24   : > { %p37_p11 = scmp.eq.s32.totalorder %s36_s10, 0  ;;  %s447_s18 = sshll.u32 %s177_s11, 3 }
  0x25   : > { %s448_s25 = sshll.u32 %s686_s16, 7  ;;  %s181_s30 = scalar_lea.vmem [#allocation2], %s447_s18 }
  0x26   : > { %s815_s19 = scalar_select %p37_p11, %s678_s14, %s39_s7  }
  0x27   : > { %s186_s29 = scalar_lea.hbm %s895_s0, %s448_s25  ;;  %s188_s4 = sshll.u32 %s181_s30, 4  ;;  %s189_s4 = int_to_ptr.vmem [resolvable:$true] %s188_s4 }
  0x28   : > { %p823_p2 = pnand %p496_p0, %p800_p12  ;;  %s178_s5 = scalar_lea.sflag [#allocation3], %s177_s11 }
  0x29   : > { %s591_s6 = scalar_lea.vmem %s189_s4, 128  ;;  %s695_s7 = smov [#allocation2]  }
  0x2a   : > { %p580_p3 = pneg %p823_p2  ;;  %p592_p5 = scmp.ne.s32.totalorder %s189_s4, %s591_s6 }
  0x2b   : > { %s596_s10 = sshll.u32 %s695_s7, 4  ;;  %s597_s10 = int_to_ptr.vmem [resolvable:$false] %s596_s10 }
  0x2c   : > { %p594_p7 = pnand %p592_p5, %p580_p3  ;;  %s598_s25 = scalar_lea.vmem %s597_s10, 256 }
  0x2d   : > { %p599_p4 = scmp.lt.s32.totalorder %s189_s4, %s597_s10  ;;  %p600_p9 = scmp.lt.s32.totalorder %s598_s25, %s591_s6 }
  0x2e   : > { %p595_p6 = pneg %p594_p7 }
  0x2f   : > { %p601_p11 = por %p600_p9, %p599_p4 }
  0x31   : > { %p602_p10 = pnand %p601_p11, %p595_p6 }
  0x33   : > { %605 = shalt.err (!%p602_p10)
}
  0x34   : > { %490 = dma.hbm_to_vmem [thread:$0]  (!%p823_p2), %s186_s29, 128, %s189_s4, %s178_s5  }
  0x35   : > { %197 = sbr.rel (%p773_p8) target bundleno = 278 (0x116), region = 32  ;;  %s834_s8 = sand.u32 (!%p773_p8), 1, %s674_s13  }
  0x36   : > { %s450_s11 = sshll.u32 (!%p773_p8), %s834_s8, 3  ;;  %s200_s18 = scalar_lea.sflag (!%p773_p8), [#allocation3], %s834_s8 }
  0x37   : > { %s203_s26 = scalar_lea.vmem (!%p773_p8), [#allocation2], %s450_s11  ;;  %p909_p12 = scmp.ne.s32.totalorder (!%p773_p8), %s902_s22, 0 }
  0x3a   : > { %657 = dma.done.wait (%p909_p12), %s200_s18, 128  }
  0x3b   : > { %659 = vsyncadd (%p909_p12), %s200_s18, 4294967168 }
  0x3c   : > { %661 = dma.done.wait (%p753_p1), [#allocation6], 512  }
  0x3d   : > { %663 = vsyncadd (%p753_p1), [#allocation6], 4294966784  ;;  %v696_v0 = vmov 0.0   ;;  %vm697_vm0 = vmmov 0   ;;  %v240_v1 = vld [vmem:[#allocation5 + $0x18] sm:$0xff]  ;;  %v239_v2 = vld [vmem:[#allocation5 + $0x10] sm:$0xff] }
  0x3e   : > { %464 = vmatprep.subr.mxu0 %v696_v0  ;;  %472 = vmatprep.mubr.msk.f32.mxu0 %vm697_vm0, %v696_v0  ;;  %v238_v3 = vld [vmem:[#allocation5 + $0x8] sm:$0xff]  ;;  %v237_v4 = vld [vmem:[#allocation5] sm:$0xff]  ;;  %v236_v5 = vld [vmem:[%s203_s26] sm:$0xff]  ;;  %vm248_vm1 = vcmask 261120   ;;  %s456_s24 = sshll.u32 %s682_s15, 7  ;;  %s232_s27 = scalar_lea.vmem [#allocation7], %s450_s11 }
  0x3f   : > { %465 = vmatpush3.msra.mxu0 %v240_v1  ;;  %v453_v6 = vld [vmem:[%s897_s2] ss:$0 sm:$0xff]  ;;  %s338_s29 = sshll.u32 %s232_s27, 4  ;;  %s853_s21 = scalar_lea.hbm %s898_s3, %s456_s24  ;;  %s339_s29 = int_to_ptr.vmem [resolvable:$true] %s338_s29 }
  0x40   : > { %466 = vmatprep.subr.mxu0 %v696_v0  ;;  %s324_s5 = scalar_lea.sflag [#allocation4], %s834_s8  ;;  %s606_s6 = scalar_lea.vmem %s339_s29, 128 }
  0x41   : > { %467 = vmatpush3.msra.mxu0 %v239_v2  ;;  %p607_p1 = scmp.ne.s32.totalorder %s339_s29, %s606_s6  ;;  %s698_s7 = smov [#allocation7]  }
  0x42   : > { %468 = vmatprep.subr.mxu0 %v696_v0  ;;  %s610_s15 = sshll.u32 %s698_s7, 4  ;;  %s611_s15 = int_to_ptr.vmem [resolvable:$false] %s610_s15 }
  0x43   : > { %469 = vmatpush3.msra.mxu0 %v238_v3  ;;  %p608_p8 = pnand %p607_p1, %p806_p13  ;;  %s612_s10 = scalar_lea.vmem %s611_s15, 256 }
  0x44   : > { %470 = vmatprep.subr.mxu0 %v696_v0  ;;  %p613_p0 = scmp.lt.s32.totalorder %s339_s29, %s611_s15  ;;  %p614_p2 = scmp.lt.s32.totalorder %s612_s10, %s606_s6 }
  0x45   : > { %471 = vmatpush3.msra.mxu0 %v237_v4  ;;  %p609_p10 = pneg %p608_p8 }
  0x46   : > { %473 = vmatmul.mubr.msk.f32.vlgmr.msra.gmra.mxu0 %vm248_vm1, %v236_v5  ;;  %p615_p3 = por %p614_p2, %p613_p0 }
  0x48   : > { %p616_p5 = pnand %p615_p3, %p609_p10 }
 0x106   : > { %v318_v7 = vpop.f32.mrf.mxu0 }
 0x107   : > { %v319_v8 = vadd.f32 %v453_v6, %v318_v7 }
 0x108   : > { %v474_v9 = vpop.f32.mrf.mxu0 }
 0x109   : > { %322 = vst.msk [vmem:[%s232_s27] sm:$0xff] %vm248_vm1, %v319_v8 }
 0x10a   : > { %619 = shalt.err (!%p616_p5)
}
 0x10b   : > { %s620_s25 = scalar_lea.hbm %s853_s21, 128  ;;  %s624_s18 = scalar_lea.hbm %s898_s3, 256 }
 0x10c   : > { %p621_p7 = scmp.ne.s32.totalorder %s853_s21, %s620_s25  ;;  %p625_p9 = scmp.lt.s32.totalorder %s853_s21, %s898_s3 }
 0x10d   : > { %p626_p11 = scmp.lt.s32.totalorder %s624_s18, %s620_s25 }
 0x10e   : > { %p622_p6 = pnand %p621_p7, %p806_p13 }
 0x10f   : > { %p627_p12 = por %p626_p11, %p625_p9 }
 0x110   : > { %p623_p4 = pneg %p622_p6 }
 0x112   : > { %p628_p1 = pnand %p627_p12, %p623_p4 }
 0x114   : > { %631 = shalt.err (!%p628_p1)
}
 0x115   : > { %481 = dma.vmem_to_hbm [thread:$0]  (%p806_p13), %s339_s29, 128, %s853_s21, %s324_s5  }
 0x116 PF: > { %s350_s22 = sand.u32 1, %s670_s12   ;;  %p910_p8 = scmp.ne.s32.totalorder %s903_s23, 0 }
 0x117   : > { %p911_p10 = scmp.ge.s32.totalorder %s690_s17, 2  ;;  %s351_s24 = scalar_lea.sflag [#allocation4], %s350_s22 }
 0x119   : > { %p492_p0 = pnand %p911_p10, %p910_p8 }
 0x11b   : > { %p493_p2 = pneg %p492_p0 }
 0x11d   : > { %665 = dma.done.wait (%p493_p2), %s351_s24, 128  }
 0x11e   : > { %667 = vsyncadd (%p493_p2), %s351_s24, 4294967168  ;;  %s20_s17 = sadd.s32 1, %s690_s17   ;;  %s912_s12 = smov %s674_s13 }
 0x11f   : > { %p17_p3 = scmp.ge.s32.totalorder %s20_s17, 4   ;;  %s913_s13 = smov %s678_s14 }
 0x120   : > { %s914_s14 = smov %s815_s19  ;;  %s915_s15 = smov %s686_s16 }
 0x121   : > { %s916_s16 = smov %s918_s28  ;;  %19 = sbr.rel (!%p17_p3) target bundleno = 7 (0x7), region = 85 }
 0x126   :  { %356 = vsyncpa [#allocation3], 1 }
 0x127   :  { %358 = vsyncpa [#allocation3 + $0x1], 1 }
 0x128   :  { %359 = vsyncpa [#allocation6], 1 }
 0x129   :  { %360 = vsyncpa [#allocation4], 1 }
 0x12a   :  { %362 = vsyncpa [#allocation4 + $0x1], 1 }

// kernel: tpu_custom_call.1
= control target key start
LH: loop header
LB: loop body
LE: loop exit
PB: predicated region body
PF: predicated region fallthrough
CT: control target
= control target key end

     0   :  { %8 = vsyncpa [#allocation3], 0  ;;  %s895_s0 = inlined_call_operand.hbm [shape: f32[16,32], index: 0, kind: input, shape index: {}]   ;;  %s896_s1 = inlined_call_operand.hbm [shape: f32[32,32], index: 1, kind: input, shape index: {}]   ;;  %s897_s2 = inlined_call_operand.vmem [shape: f32[1,32], index: 2, kind: input, shape index: {}]   ;;  %s898_s3 = inlined_call_operand.hbm [shape: f32[16,32], index: 3, kind: output, shape index: {}]  }
   0x1   :  { %10 = vsyncpa [#allocation3 + $0x1], 0 }
   0x2   :  { %11 = vsyncpa [#allocation6], 0 }
   0x3   :  { %12 = vsyncpa [#allocation4], 0 }
   0x4   :  { %14 = vsyncpa [#allocation4 + $0x1], 0  ;;  %s719_s12 = smov 0   ;;  %s721_s13 = smov 0  }
   0x5   :  { %s723_s14 = smov 0   ;;  %s725_s15 = smov 0  }
   0x6   :  { %s727_s16 = smov 0   ;;  %s729_s17 = smov 0  }
   0x7 LB: > { %s441_s18 = sadd.s32 4294967295, %s690_s17   ;;  %s442_s19 = sadd.s32 4294967294, %s690_s17   ;;  %s690_s17 = sphi %s729_s17, %s20_s17   ;;  %s686_s16 = sphi %s727_s16, %s916_s16   ;;  %s682_s15 = sphi %s725_s15, %s915_s15   ;;  %s678_s14 = sphi %s723_s14, %s914_s14   ;;  %s674_s13 = sphi %s721_s13, %s913_s13   ;;  %s670_s12 = sphi %s719_s12, %s912_s12  }
   0x8   : > { %p52_p0 = scmp.ne.s32.totalorder %s674_s13, %s670_s12  ;;  %p753_p1 = scmp.eq.s32.totalorder %s441_s18, 0 }
   0x9   : > { %p757_p2 = scmp.eq.s32.totalorder %s441_s18, 1  ;;  %p136_p3 = scmp.eq.s32.totalorder %s442_s19, 1 }
   0xa   : > { %p763_p4 = por %p753_p1, %p52_p0  ;;  %p443_p5 = scmp.ge.s32.totalorder %s690_s17, 1 }
   0xb   : > { %p768_p6 = por %p136_p3, %p52_p0  ;;  %p143_p7 = scmp.lt.s32.totalorder %s690_s17, 3 }
   0xc   : > { %s902_s22 = scalar_select %p763_p4, 1, 0 }
   0xd   : > { %s903_s23 = scalar_select %p768_p6, 1, 0 }
   0xe   : > { %p773_p8 = pnand %p443_p5, %p143_p7  ;;  %s692_s25 = smov [#allocation5]  }
   0xf   : > { %s157_s26 = sshll.u32 %s692_s25, 4  ;;  %s32_s28 = sadd.s32 1, %s686_s16  ;;  %s158_s26 = int_to_ptr.vmem [resolvable:$true] %s157_s26 }
  0x10   : > { %p483_p9 = pneg %p773_p8  ;;  %s563_s29 = scalar_lea.vmem %s158_s26, 512 }
  0x11   : > { %p564_p13 = scmp.ne.s32.totalorder %s158_s26, %s563_s29  ;;  %p571_p5 = scmp.lt.s32.totalorder %s158_s26, %s158_s26 }
  0x12   : > { %p782_p11 = pnand %p483_p9, %p753_p1  ;;  %p572_p7 = scmp.lt.s32.totalorder %s563_s29, %s563_s29 }
  0x14   : > { %p554_p12 = pneg %p782_p11  ;;  %p573_p6 = por %p572_p7, %p571_p5 }
  0x16   : > { %p566_p0 = pnand %p564_p13, %p554_p12 }
  0x18   : > { %p567_p3 = pneg %p566_p0 }
  0x1a   : > { %p574_p4 = pnand %p573_p6, %p567_p3 }
  0x1c   : > { %577 = shalt.err (!%p574_p4)
}
  0x1d   : > { %s693_s30 = smov 128   ;;  %s694_s4 = smov 8  }
  0x1e   : > { %486 = dma.hbm_to_vmem [thread:$0]  (!%p782_p11), %s896_s1, 512, %s158_s26, [#allocation6], %s693_s30, %s693_s30, %s694_s4  }
  0x1f   : > { %p34_p6 = scmp.ge.s32.totalorder %s32_s28, 2  ;;  %s39_s7 = sadd.s32 1, %s678_s14 }
  0x20   : > { %p46_p4 = scmp.ne.s32.totalorder %s678_s14, %s674_s13  ;;  %p47_p9 = scmp.eq.s32.totalorder %s690_s17, 0 }
  0x21   : > { %s918_s28 = smov (%p34_p6, %s32_s28), 0  ;;  %p496_p0 = scmp.lt.s32.totalorder %s690_s17, 2 }
  0x22   : > { %p800_p12 = por %p47_p9, %p46_p4  ;;  %p806_p13 = por %p757_p2, %p46_p4 }
  0x23   : > { %s36_s10 = ssub.s32 %s686_s16, %s918_s28  ;;  %s177_s11 = sand.u32 1, %s678_s14  }
  0x24   : > { %p37_p11 = scmp.eq.s32.totalorder %s36_s10, 0  ;;  %s447_s18 = sshll.u32 %s177_s11, 3 }
  0x25   : > { %s448_s25 = sshll.u32 %s686_s16, 7  ;;  %s181_s30 = scalar_lea.vmem [#allocation2], %s447_s18 }
  0x26   : > { %s815_s19 = scalar_select %p37_p11, %s678_s14, %s39_s7  }
  0x27   : > { %s186_s29 = scalar_lea.hbm %s895_s0, %s448_s25  ;;  %s188_s4 = sshll.u32 %s181_s30, 4  ;;  %s189_s4 = int_to_ptr.vmem [resolvable:$true] %s188_s4 }
  0x28   : > { %p823_p2 = pnand %p496_p0, %p800_p12  ;;  %s178_s5 = scalar_lea.sflag [#allocation3], %s177_s11 }
  0x29   : > { %s591_s6 = scalar_lea.vmem %s189_s4, 128  ;;  %s695_s7 = smov [#allocation2]  }
  0x2a   : > { %p580_p3 = pneg %p823_p2  ;;  %p592_p5 = scmp.ne.s32.totalorder %s189_s4, %s591_s6 }
  0x2b   : > { %s596_s10 = sshll.u32 %s695_s7, 4  ;;  %s597_s10 = int_to_ptr.vmem [resolvable:$false] %s596_s10 }
  0x2c   : > { %p594_p7 = pnand %p592_p5, %p580_p3  ;;  %s598_s25 = scalar_lea.vmem %s597_s10, 256 }
  0x2d   : > { %p599_p4 = scmp.lt.s32.totalorder %s189_s4, %s597_s10  ;;  %p600_p9 = scmp.lt.s32.totalorder %s598_s25, %s591_s6 }
  0x2e   : > { %p595_p6 = pneg %p594_p7 }
  0x2f   : > { %p601_p11 = por %p600_p9, %p599_p4 }
  0x31   : > { %p602_p10 = pnand %p601_p11, %p595_p6 }
  0x33   : > { %605 = shalt.err (!%p602_p10)
}
  0x34   : > { %490 = dma.hbm_to_vmem [thread:$0]  (!%p823_p2), %s186_s29, 128, %s189_s4, %s178_s5  }
  0x35   : > { %197 = sbr.rel (%p773_p8) target bundleno = 278 (0x116), region = 32  ;;  %s834_s8 = sand.u32 (!%p773_p8), 1, %s674_s13  }
  0x36   : > { %s450_s11 = sshll.u32 (!%p773_p8), %s834_s8, 3  ;;  %s200_s18 = scalar_lea.sflag (!%p773_p8), [#allocation3], %s834_s8 }
  0x37   : > { %s203_s26 = scalar_lea.vmem (!%p773_p8), [#allocation2], %s450_s11  ;;  %p909_p12 = scmp.ne.s32.totalorder (!%p773_p8), %s902_s22, 0 }
  0x3a   : > { %657 = dma.done.wait (%p909_p12), %s200_s18, 128  }
  0x3b   : > { %659 = vsyncadd (%p909_p12), %s200_s18, 4294967168 }
  0x3c   : > { %661 = dma.done.wait (%p753_p1), [#allocation6], 512  }
  0x3d   : > { %663 = vsyncadd (%p753_p1), [#allocation6], 4294966784  ;;  %v696_v0 = vmov 0.0   ;;  %vm697_vm0 = vmmov 0   ;;  %v240_v1 = vld [vmem:[#allocation5 + $0x18] sm:$0xff]  ;;  %v239_v2 = vld [vmem:[#allocation5 + $0x10] sm:$0xff] }
  0x3e   : > { %464 = vmatprep.subr.mxu0 %v696_v0  ;;  %472 = vmatprep.mubr.msk.f32.mxu0 %vm697_vm0, %v696_v0  ;;  %v238_v3 = vld [vmem:[#allocation5 + $0x8] sm:$0xff]  ;;  %v237_v4 = vld [vmem:[#allocation5] sm:$0xff]  ;;  %v236_v5 = vld [vmem:[%s203_s26] sm:$0xff]  ;;  %vm248_vm1 = vcmask 261120   ;;  %s456_s24 = sshll.u32 %s682_s15, 7  ;;  %s232_s27 = scalar_lea.vmem [#allocation7], %s450_s11 }
  0x3f   : > { %465 = vmatpush3.msra.mxu0 %v240_v1  ;;  %v453_v6 = vld [vmem:[%s897_s2] ss:$0 sm:$0xff]  ;;  %s338_s29 = sshll.u32 %s232_s27, 4  ;;  %s853_s21 = scalar_lea.hbm %s898_s3, %s456_s24  ;;  %s339_s29 = int_to_ptr.vmem [resolvable:$true] %s338_s29 }
  0x40   : > { %466 = vmatprep.subr.mxu0 %v696_v0  ;;  %s324_s5 = scalar_lea.sflag [#allocation4], %s834_s8  ;;  %s606_s6 = scalar_lea.vmem %s339_s29, 128 }
  0x41   : > { %467 = vmatpush3.msra.mxu0 %v239_v2  ;;  %p607_p1 = scmp.ne.s32.totalorder %s339_s29, %s606_s6  ;;  %s698_s7 = smov [#allocation7]  }
  0x42   : > { %468 = vmatprep.subr.mxu0 %v696_v0  ;;  %s610_s15 = sshll.u32 %s698_s7, 4  ;;  %s611_s15 = int_to_ptr.vmem [resolvable:$false] %s610_s15 }
  0x43   : > { %469 = vmatpush3.msra.mxu0 %v238_v3  ;;  %p608_p8 = pnand %p607_p1, %p806_p13  ;;  %s612_s10 = scalar_lea.vmem %s611_s15, 256 }
  0x44   : > { %470 = vmatprep.subr.mxu0 %v696_v0  ;;  %p613_p0 = scmp.lt.s32.totalorder %s339_s29, %s611_s15  ;;  %p614_p2 = scmp.lt.s32.totalorder %s612_s10, %s606_s6 }
  0x45   : > { %471 = vmatpush3.msra.mxu0 %v237_v4  ;;  %p609_p10 = pneg %p608_p8 }
  0x46   : > { %473 = vmatmul.mubr.msk.f32.vlgmr.msra.gmra.mxu0 %vm248_vm1, %v236_v5  ;;  %p615_p3 = por %p614_p2, %p613_p0 }
  0x48   : > { %p616_p5 = pnand %p615_p3, %p609_p10 }
 0x106   : > { %v318_v7 = vpop.f32.mrf.mxu0 }
 0x107   : > { %v319_v8 = vadd.f32 %v453_v6, %v318_v7 }
 0x108   : > { %v474_v9 = vpop.f32.mrf.mxu0 }
 0x109   : > { %322 = vst.msk [vmem:[%s232_s27] sm:$0xff] %vm248_vm1, %v319_v8 }
 0x10a   : > { %619 = shalt.err (!%p616_p5)
}
 0x10b   : > { %s620_s25 = scalar_lea.hbm %s853_s21, 128  ;;  %s624_s18 = scalar_lea.hbm %s898_s3, 256 }
 0x10c   : > { %p621_p7 = scmp.ne.s32.totalorder %s853_s21, %s620_s25  ;;  %p625_p9 = scmp.lt.s32.totalorder %s853_s21, %s898_s3 }
 0x10d   : > { %p626_p11 = scmp.lt.s32.totalorder %s624_s18, %s620_s25 }
 0x10e   : > { %p622_p6 = pnand %p621_p7, %p806_p13 }
 0x10f   : > { %p627_p12 = por %p626_p11, %p625_p9 }
 0x110   : > { %p623_p4 = pneg %p622_p6 }
 0x112   : > { %p628_p1 = pnand %p627_p12, %p623_p4 }
 0x114   : > { %631 = shalt.err (!%p628_p1)
}
 0x115   : > { %481 = dma.vmem_to_hbm [thread:$0]  (%p806_p13), %s339_s29, 128, %s853_s21, %s324_s5  }
 0x116 PF: > { %s350_s22 = sand.u32 1, %s670_s12   ;;  %p910_p8 = scmp.ne.s32.totalorder %s903_s23, 0 }
 0x117   : > { %p911_p10 = scmp.ge.s32.totalorder %s690_s17, 2  ;;  %s351_s24 = scalar_lea.sflag [#allocation4], %s350_s22 }
 0x119   : > { %p492_p0 = pnand %p911_p10, %p910_p8 }
 0x11b   : > { %p493_p2 = pneg %p492_p0 }
 0x11d   : > { %665 = dma.done.wait (%p493_p2), %s351_s24, 128  }
 0x11e   : > { %667 = vsyncadd (%p493_p2), %s351_s24, 4294967168  ;;  %s20_s17 = sadd.s32 1, %s690_s17   ;;  %s912_s12 = smov %s674_s13 }
 0x11f   : > { %p17_p3 = scmp.ge.s32.totalorder %s20_s17, 4   ;;  %s913_s13 = smov %s678_s14 }
 0x120   : > { %s914_s14 = smov %s815_s19  ;;  %s915_s15 = smov %s686_s16 }
 0x121   : > { %s916_s16 = smov %s918_s28  ;;  %19 = sbr.rel (!%p17_p3) target bundleno = 7 (0x7), region = 85 }
 0x126   :  { %356 = vsyncpa [#allocation3], 1 }
 0x127   :  { %358 = vsyncpa [#allocation3 + $0x1], 1 }
 0x128   :  { %359 = vsyncpa [#allocation6], 1 }
 0x129   :  { %360 = vsyncpa [#allocation4], 1 }
 0x12a   :  { %362 = vsyncpa [#allocation4 + $0x1], 1 }

</bundles_post_ra>
